<compile_context>
chip_gen: v6e
topology: v6e:2x2x1
jax: 0.10.0
libtpu: 0.0.40
codegen_flags: <defaults>
</compile_context>

<pallas_src>
import jax
import jax.numpy as jnp
from jax.experimental import pallas as pl
from jax.experimental.pallas import tpu as pltpu


def _bilstm_tag_kernel(emb_ref, wih_ref, b_ref, whh_ref,
                       wo_f_ref, wo_b_ref, bo_ref,
                       out_ref,
                       gin_ref, hf_all, hb_all):
    """Per-grid-block kernel: everything for this N-tile lives in VMEM.

    emb_ref : (T, Nb, E)     bf16  input sequence tile (time-major)
    wih_ref : (E, 8H)        bf16  fused fwd|bwd input->gate weights, gate order (i,f,o,g)
    b_ref   : (1, 8H)        f32   fused biases (b_ih + b_hh, fwd|bwd)
    whh_ref : (2H, 8H)       bf16  block-diag [whh_f 0; 0 whh_b]
    wo_f/b  : (H, Kpad)      bf16  hidden2tag weight halves, lane-padded
    bo_ref  : (1, Kpad)      f32   hidden2tag bias, lane-padded
    out_ref : (T, Nb, Kpad)  f32   lane-dense tag-feature tile
    gin_ref : (T, Nb, 8H)    f32   scratch: precomputed input-gate contributions
    hf_all/hb_all : (T, Nb, H) bf16 scratch: per-direction hiddens
    """
    T, Nb, E = emb_ref.shape
    G2 = whh_ref.shape[1]        # 8 * Hh (both directions)
    G = G2 // 2                  # 4 * Hh per direction
    Hh = G // 4

    # ---- fused input projection: one lane-dense MXU pass, bias pre-added ----
    emb2d = emb_ref[...].reshape(T * Nb, E)
    gin_ref[...] = (jnp.dot(emb2d, wih_ref[...],
                            preferred_element_type=jnp.float32)
                    + b_ref[...]).reshape(T, Nb, G2)

    whh = whh_ref[...]           # (2Hh, 8Hh) bf16, loaded once

    def gates_to_hc(gates, c_prev):
        # gate order (i, f, o, g): one sigmoid over a contiguous 3Hh slice, one tanh.
        sig = jax.nn.sigmoid(gates[:, :3 * Hh])
        g = jnp.tanh(gates[:, 3 * Hh:])
        i = sig[:, 0 * Hh:1 * Hh]
        f = sig[:, 1 * Hh:2 * Hh]
        o = sig[:, 2 * Hh:3 * Hh]
        c = f * c_prev + i * g
        h = o * jnp.tanh(c)
        return h, c

    zeros = jnp.zeros((Nb, Hh), jnp.float32)

    # ---- interleaved fwd/bwd recurrence: one merged matmul per step ----
    def step(s, carry):
        hf, cf, hb, cb = carry
        tb = T - 1 - s
        h_cat = jnp.concatenate([hf, hb], axis=-1).astype(whh.dtype)    # (Nb, 2Hh)
        rec = jnp.dot(h_cat, whh, preferred_element_type=jnp.float32)   # (Nb, 8Hh)
        gates_f = gin_ref[s][:, :G] + rec[:, :G]
        gates_b = gin_ref[tb][:, G:] + rec[:, G:]
        hf, cf = gates_to_hc(gates_f, cf)
        hb, cb = gates_to_hc(gates_b, cb)
        hf_all[s] = hf.astype(hf_all.dtype)
        hb_all[tb] = hb.astype(hb_all.dtype)
        return hf, cf, hb, cb

    # partial unroll: enough lookahead to hide MXU latency without blowing vregs.
    jax.lax.fori_loop(0, T, step, (zeros, zeros, zeros, zeros),
                      unroll=min(T, 4))

    # ---- fused hidden2tag over the whole (T*Nb, Hh) slabs: bf16 MXU, one store ----
    hf2d = hf_all[...].reshape(T * Nb, Hh)
    hb2d = hb_all[...].reshape(T * Nb, Hh)
    feats = (jnp.dot(hf2d, wo_f_ref[...], preferred_element_type=jnp.float32)
             + jnp.dot(hb2d, wo_b_ref[...], preferred_element_type=jnp.float32)
             + bo_ref[...])
    out_ref[...] = feats.reshape(T, Nb, -1).astype(out_ref.dtype)


def _pick_n_block(n, cap=256):
    """Largest multiple-of-8 divisor of n that is <= cap; else the whole axis."""
    if n <= cap:
        return n
    for cand in range(cap - (cap % 8), 7, -8):
        if n % cand == 0:
            return cand
    return n


def nerlstm_crf_forward(x, params):
    """Replicates NERLSTM_CRF.forward(x) at inference (Dropout == identity)."""
    # Embedding lookup (pure gather) stays as JAX glue; table kept bf16.
    emb = jnp.take(params["embedding"].astype(jnp.bfloat16), x, axis=0)  # (T, N, E)
    T, N, E = emb.shape
    Hh = params["whh_f"].shape[0]
    G = 4 * Hh
    K = params["wo_f"].shape[1]
    Kpad = ((K + 127) // 128) * 128

    def reorder(w):  # PyTorch gate order (i,f,g,o) -> (i,f,o,g)
        i, f, g, o = jnp.split(w, 4, axis=-1)
        return jnp.concatenate([i, f, o, g], axis=-1)

    bf16 = lambda a: a.astype(jnp.bfloat16)

    wih_f, wih_b = reorder(params["wih_f"]), reorder(params["wih_b"])
    whh_f, whh_b = reorder(params["whh_f"]), reorder(params["whh_b"])
    b_f, b_b = reorder(params["b_f"]), reorder(params["b_b"])

    # Fused (E, 8Hh) input-projection weight + (1, 8Hh) bias (fwd | bwd).
    wih_fb = bf16(jnp.concatenate([wih_f, wih_b], axis=1))
    b_fb = jnp.concatenate([b_f, b_b], axis=1).astype(jnp.float32)

    # Block-diagonal recurrent weight: [h_f | h_b] @ whh_blk = [gates_f | gates_b].
    zblk = jnp.zeros((Hh, G), jnp.float32)
    whh_blk = bf16(jnp.concatenate(
        [jnp.concatenate([whh_f, zblk], axis=1),
         jnp.concatenate([zblk, whh_b], axis=1)], axis=0))               # (2Hh, 8Hh)

    pad_k = lambda a: jnp.pad(a, ((0, 0), (0, Kpad - K)))
    wo_f = bf16(pad_k(params["wo_f"]))
    wo_b = bf16(pad_k(params["wo_b"]))
    b_o = pad_k(params["b_o"]).astype(jnp.float32)

    # Grid over the embarrassingly-parallel sent_len (N) axis.
    n_blk = _pick_n_block(N)
    grid = (N // n_blk,)

    out3d = pl.pallas_call(
        _bilstm_tag_kernel,
        out_shape=jax.ShapeDtypeStruct((T, N, Kpad), jnp.float32),
        grid=grid,
        in_specs=[
            pl.BlockSpec((T, n_blk, E), lambda n: (0, n, 0)),        # emb tile
            pl.BlockSpec((E, 2 * G), lambda n: (0, 0)),              # wih fused
            pl.BlockSpec((1, 2 * G), lambda n: (0, 0)),              # bias fused
            pl.BlockSpec((2 * Hh, 2 * G), lambda n: (0, 0)),         # whh block-diag
            pl.BlockSpec((Hh, Kpad), lambda n: (0, 0)),              # wo fwd half
            pl.BlockSpec((Hh, Kpad), lambda n: (0, 0)),              # wo bwd half
            pl.BlockSpec((1, Kpad), lambda n: (0, 0)),               # output bias
        ],
        out_specs=pl.BlockSpec((T, n_blk, Kpad), lambda n: (0, n, 0)),
        scratch_shapes=[
            pltpu.VMEM((T, n_blk, 2 * G), jnp.float32),   # fused input-gate slab
            pltpu.VMEM((T, n_blk, Hh), jnp.bfloat16),     # fwd hiddens
            pltpu.VMEM((T, n_blk, Hh), jnp.bfloat16),     # bwd hiddens
        ],
        compiler_params=pltpu.CompilerParams(
            dimension_semantics=("parallel",),
            vmem_limit_bytes=32 * 1024 * 1024),
    )(emb, wih_fb, b_fb, whh_blk, wo_f, wo_b, b_o)

    # PyTorch contract: (batch, sent_len, tagset_size + 2).
    return out3d[:, :, :K]


def make_params(key, vocab_size_arg, embed_size, hidden_dim, seq_len):
    """Deterministic synthetic parameters mirroring the PyTorch module's shapes."""
    vocab = vocab_size_arg + 1
    Hh = hidden_dim // 2            # hidden per direction
    K = seq_len + 2                 # tagset_size + 2
    ks = jax.random.split(key, 10)
    s_lstm = 1.0 / jnp.sqrt(Hh)
    s_lin = 1.0 / jnp.sqrt(hidden_dim)
    u = lambda k, shp, s: jax.random.uniform(k, shp, jnp.float32, -s, s)
    return {
        "embedding": jax.random.normal(ks[0], (vocab, embed_size), jnp.float32),
        # forward direction (PyTorch gate order i, f, g, o; stored transposed: (in, 4H))
        "wih_f": u(ks[1], (embed_size, 4 * Hh), s_lstm),
        "whh_f": u(ks[2], (Hh, 4 * Hh), s_lstm),
        "b_f":   u(ks[3], (1, 4 * Hh), s_lstm),   # b_ih + b_hh combined
        # backward direction
        "wih_b": u(ks[4], (embed_size, 4 * Hh), s_lstm),
        "whh_b": u(ks[5], (Hh, 4 * Hh), s_lstm),
        "b_b":   u(ks[6], (1, 4 * Hh), s_lstm),
        # hidden2tag: (hidden_dim, K) split into fwd/bwd halves of the concat
        "wo_f":  u(ks[7], (Hh, K), s_lin),
        "wo_b":  u(ks[8], (Hh, K), s_lin),
        "b_o":   u(ks[9], (1, K), s_lin),
    }


if __name__ == "__main__":
    # Small config consistent with the module's __init__:
    #   embed_size=32, hidden_dim=32, vocab_size=100 (+1), seq_len(=tagset_size)=8
    EMBED, HIDDEN, VOCAB_ARG, SEQ_LEN = 32, 32, 100, 8
    BATCH, SENT_LEN = 4, 8

    key = jax.random.PRNGKey(0)
    k_tok, k_par = jax.random.split(key)
    params = make_params(k_par, VOCAB_ARG, EMBED, HIDDEN, SEQ_LEN)
    x = jax.random.randint(k_tok, (BATCH, SENT_LEN), 0, VOCAB_ARG + 1, dtype=jnp.int32)

    out = nerlstm_crf_forward(x, params)
    out = jax.block_until_ready(out)
    assert out.shape == (BATCH, SENT_LEN, SEQ_LEN + 2), out.shape
    assert out.dtype == jnp.float32
    assert bool(jnp.all(jnp.isfinite(out)))
    print("KERNEL_OK")
</pallas_src>

<mosaic_0001>
module attributes {stable_mosaic.version = 11 : i64} {
  func.func @_bilstm_tag_kernel(%arg0: i32, %arg1: memref<4x8x32xbf16, #tpu.memory_space<vmem>>, %arg2: memref<32x128xbf16, #tpu.memory_space<vmem>>, %arg3: memref<1x128xf32, #tpu.memory_space<vmem>>, %arg4: memref<32x128xbf16, #tpu.memory_space<vmem>>, %arg5: memref<16x128xbf16, #tpu.memory_space<vmem>>, %arg6: memref<16x128xbf16, #tpu.memory_space<vmem>>, %arg7: memref<1x128xf32, #tpu.memory_space<vmem>>, %arg8: memref<4x8x128xf32, #tpu.memory_space<vmem>>, %arg9: memref<4x8x128xf32, #tpu.memory_space<vmem>>, %arg10: memref<4x8x16xbf16, #tpu.memory_space<vmem>>, %arg11: memref<4x8x16xbf16, #tpu.memory_space<vmem>>) attributes {dimension_semantics = [#tpu.dimension_semantics<parallel>], iteration_bounds = array<i64: 1>, scalar_prefetch = 0 : i64, scratch_operands = 3 : i64, tpu.core_type = #tpu.core_type<tc>, window_params = [{transform_indices = @transform_0, window_bounds = array<i64: 4, 8, 32>}, {pipeline_mode = #tpu.pipeline_mode<synchronous>, transform_indices = @transform_1, window_bounds = array<i64: 32, 128>}, {pipeline_mode = #tpu.pipeline_mode<synchronous>, transform_indices = @transform_2, window_bounds = array<i64: 1, 128>}, {pipeline_mode = #tpu.pipeline_mode<synchronous>, transform_indices = @transform_3, window_bounds = array<i64: 32, 128>}, {pipeline_mode = #tpu.pipeline_mode<synchronous>, transform_indices = @transform_4, window_bounds = array<i64: 16, 128>}, {pipeline_mode = #tpu.pipeline_mode<synchronous>, transform_indices = @transform_5, window_bounds = array<i64: 16, 128>}, {pipeline_mode = #tpu.pipeline_mode<synchronous>, transform_indices = @transform_6, window_bounds = array<i64: 1, 128>}, {transform_indices = @transform_7, window_bounds = array<i64: 4, 8, 128>}]} {
    %c0 = arith.constant 0 : index
    %c0_0 = arith.constant 0 : index
    %c0_1 = arith.constant 0 : index
    %0 = vector.load %arg1[%c0, %c0_0, %c0_1] : memref<4x8x32xbf16, #tpu.memory_space<vmem>>, vector<4x8x32xbf16>
    %1 = vector.shape_cast %0 : vector<4x8x32xbf16> to vector<32x32xbf16>
    %c0_2 = arith.constant 0 : index
    %c0_3 = arith.constant 0 : index
    %2 = vector.load %arg2[%c0_2, %c0_3] : memref<32x128xbf16, #tpu.memory_space<vmem>>, vector<32x128xbf16>
    %cst = arith.constant dense<0.000000e+00> : vector<32x128xf32>
    %3 = tpu.matmul %1, %2, %cst {dimension_numbers = #tpu.dot_dimension_numbers<[1], [0], [0], [1], [0, 0, 1, 1], [], []>} : vector<32x32xbf16>, vector<32x128xbf16>, vector<32x128xf32> -> vector<32x128xf32>
    %c0_4 = arith.constant 0 : index
    %c0_5 = arith.constant 0 : index
    %4 = vector.load %arg3[%c0_4, %c0_5] : memref<1x128xf32, #tpu.memory_space<vmem>>, vector<1x128xf32>
    %5 = vector.broadcast %4 : vector<1x128xf32> to vector<32x128xf32>
    %6 = arith.addf %3, %5 : vector<32x128xf32>
    %7 = vector.shape_cast %6 : vector<32x128xf32> to vector<4x8x128xf32>
    %c0_6 = arith.constant 0 : index
    %c0_7 = arith.constant 0 : index
    %c0_8 = arith.constant 0 : index
    %8 = vector.load %arg9[%c0_6, %c0_7, %c0_8] : memref<4x8x128xf32, #tpu.memory_space<vmem>>, vector<4x8x128xf32>
    tpu.vector_store %arg9[%c0_6, %c0_7, %c0_8], %7 {strides = array<i32>} : memref<4x8x128xf32, #tpu.memory_space<vmem>>, vector<4x8x128xf32>,
    %c0_9 = arith.constant 0 : index
    %c0_10 = arith.constant 0 : index
    %9 = vector.load %arg4[%c0_9, %c0_10] : memref<32x128xbf16, #tpu.memory_space<vmem>>, vector<32x128xbf16>
    %cst_11 = arith.constant 0.000000e+00 : f32
    %10 = vector.broadcast %cst_11 : f32 to vector<8x16xf32>
    %c0_i32 = arith.constant 0 : i32
    %c3_i32 = arith.constant 3 : i32
    %11 = arith.subi %c3_i32, %c0_i32 : i32
    %12 = tpu.concatenate %10, %10 in 1 : vector<8x16xf32>, vector<8x16xf32> -> vector<8x32xf32>
    %13 = arith.truncf %12 : vector<8x32xf32> to vector<8x32xbf16>
    %cst_12 = arith.constant dense<0.000000e+00> : vector<8x128xf32>
    %14 = tpu.matmul %13, %9, %cst_12 {dimension_numbers = #tpu.dot_dimension_numbers<[1], [0], [0], [1], [0, 0, 1, 1], [], []>} : vector<8x32xbf16>, vector<32x128xbf16>, vector<8x128xf32> -> vector<8x128xf32>
    %15 = arith.index_cast %c0_i32 : i32 to index
    %c0_13 = arith.constant 0 : index
    %c0_14 = arith.constant 0 : index
    %16 = vector.load %arg9[%15, %c0_13, %c0_14] : memref<4x8x128xf32, #tpu.memory_space<vmem>>, vector<1x8x128xf32>
    %17 = vector.shape_cast %16 : vector<1x8x128xf32> to vector<8x128xf32>
    %18 = vector.extract_strided_slice %17 {offsets = [0, 0], sizes = [8, 64], strides = [1, 1]} : vector<8x128xf32> to vector<8x64xf32>
    %19 = vector.extract_strided_slice %14 {offsets = [0, 0], sizes = [8, 64], strides = [1, 1]} : vector<8x128xf32> to vector<8x64xf32>
    %20 = arith.addf %18, %19 : vector<8x64xf32>
    %21 = arith.index_cast %11 : i32 to index
    %c0_15 = arith.constant 0 : index
    %c0_16 = arith.constant 0 : index
    %22 = vector.load %arg9[%21, %c0_15, %c0_16] : memref<4x8x128xf32, #tpu.memory_space<vmem>>, vector<1x8x128xf32>
    %23 = vector.shape_cast %22 : vector<1x8x128xf32> to vector<8x128xf32>
    %24 = vector.extract_strided_slice %23 {offsets = [0, 64], sizes = [8, 64], strides = [1, 1]} : vector<8x128xf32> to vector<8x64xf32>
    %25 = vector.extract_strided_slice %14 {offsets = [0, 64], sizes = [8, 64], strides = [1, 1]} : vector<8x128xf32> to vector<8x64xf32>
    %26 = arith.addf %24, %25 : vector<8x64xf32>
    %27 = vector.extract_strided_slice %20 {offsets = [0, 0], sizes = [8, 48], strides = [1, 1]} : vector<8x64xf32> to vector<8x48xf32>
    %28 = arith.negf %27 : vector<8x48xf32>
    %29 = math.exp %28 : vector<8x48xf32>
    %cst_17 = arith.constant 1.000000e+00 : f32
    %30 = vector.broadcast %cst_17 : f32 to vector<8x48xf32>
    %31 = arith.addf %30, %29 : vector<8x48xf32>
    %32 = arith.divf %30, %31 : vector<8x48xf32>
    %33 = vector.extract_strided_slice %20 {offsets = [0, 48], sizes = [8, 16], strides = [1, 1]} : vector<8x64xf32> to vector<8x16xf32>
    %34 = math.tanh %33 : vector<8x16xf32>
    %35 = vector.extract_strided_slice %32 {offsets = [0, 0], sizes = [8, 16], strides = [1, 1]} : vector<8x48xf32> to vector<8x16xf32>
    %36 = vector.extract_strided_slice %32 {offsets = [0, 16], sizes = [8, 16], strides = [1, 1]} : vector<8x48xf32> to vector<8x16xf32>
    %37 = vector.extract_strided_slice %32 {offsets = [0, 32], sizes = [8, 16], strides = [1, 1]} : vector<8x48xf32> to vector<8x16xf32>
    %38 = arith.mulf %36, %10 : vector<8x16xf32>
    %39 = arith.mulf %35, %34 : vector<8x16xf32>
    %40 = arith.addf %38, %39 : vector<8x16xf32>
    %41 = math.tanh %40 : vector<8x16xf32>
    %42 = arith.mulf %37, %41 : vector<8x16xf32>
    %43 = vector.extract_strided_slice %26 {offsets = [0, 0], sizes = [8, 48], strides = [1, 1]} : vector<8x64xf32> to vector<8x48xf32>
    %44 = arith.negf %43 : vector<8x48xf32>
    %45 = math.exp %44 : vector<8x48xf32>
    %cst_18 = arith.constant 1.000000e+00 : f32
    %46 = vector.broadcast %cst_18 : f32 to vector<8x48xf32>
    %47 = arith.addf %46, %45 : vector<8x48xf32>
    %48 = arith.divf %46, %47 : vector<8x48xf32>
    %49 = vector.extract_strided_slice %26 {offsets = [0, 48], sizes = [8, 16], strides = [1, 1]} : vector<8x64xf32> to vector<8x16xf32>
    %50 = math.tanh %49 : vector<8x16xf32>
    %51 = vector.extract_strided_slice %48 {offsets = [0, 0], sizes = [8, 16], strides = [1, 1]} : vector<8x48xf32> to vector<8x16xf32>
    %52 = vector.extract_strided_slice %48 {offsets = [0, 16], sizes = [8, 16], strides = [1, 1]} : vector<8x48xf32> to vector<8x16xf32>
    %53 = vector.extract_strided_slice %48 {offsets = [0, 32], sizes = [8, 16], strides = [1, 1]} : vector<8x48xf32> to vector<8x16xf32>
    %54 = arith.mulf %52, %10 : vector<8x16xf32>
    %55 = arith.mulf %51, %50 : vector<8x16xf32>
    %56 = arith.addf %54, %55 : vector<8x16xf32>
    %57 = math.tanh %56 : vector<8x16xf32>
    %58 = arith.mulf %53, %57 : vector<8x16xf32>
    %59 = arith.truncf %42 : vector<8x16xf32> to vector<8x16xbf16>
    %60 = arith.index_cast %c0_i32 : i32 to index
    %c0_19 = arith.constant 0 : index
    %c0_20 = arith.constant 0 : index
    %61 = vector.load %arg10[%60, %c0_19, %c0_20] : memref<4x8x16xbf16, #tpu.memory_space<vmem>>, vector<1x8x16xbf16>
    %62 = vector.shape_cast %61 : vector<1x8x16xbf16> to vector<8x16xbf16>
    %63 = vector.shape_cast %59 : vector<8x16xbf16> to vector<1x8x16xbf16>
    tpu.vector_store %arg10[%60, %c0_19, %c0_20], %63 {strides = array<i32>} : memref<4x8x16xbf16, #tpu.memory_space<vmem>>, vector<1x8x16xbf16>,
    %64 = arith.truncf %58 : vector<8x16xf32> to vector<8x16xbf16>
    %65 = arith.index_cast %11 : i32 to index
    %c0_21 = arith.constant 0 : index
    %c0_22 = arith.constant 0 : index
    %66 = vector.load %arg11[%65, %c0_21, %c0_22] : memref<4x8x16xbf16, #tpu.memory_space<vmem>>, vector<1x8x16xbf16>
    %67 = vector.shape_cast %66 : vector<1x8x16xbf16> to vector<8x16xbf16>
    %68 = vector.shape_cast %64 : vector<8x16xbf16> to vector<1x8x16xbf16>
    tpu.vector_store %arg11[%65, %c0_21, %c0_22], %68 {strides = array<i32>} : memref<4x8x16xbf16, #tpu.memory_space<vmem>>, vector<1x8x16xbf16>,
    %c1_i32 = arith.constant 1 : i32
    %c3_i32_23 = arith.constant 3 : i32
    %69 = arith.subi %c3_i32_23, %c1_i32 : i32
    %70 = tpu.concatenate %42, %58 in 1 : vector<8x16xf32>, vector<8x16xf32> -> vector<8x32xf32>
    %71 = arith.truncf %70 : vector<8x32xf32> to vector<8x32xbf16>
    %cst_24 = arith.constant dense<0.000000e+00> : vector<8x128xf32>
    %72 = tpu.matmul %71, %9, %cst_24 {dimension_numbers = #tpu.dot_dimension_numbers<[1], [0], [0], [1], [0, 0, 1, 1], [], []>} : vector<8x32xbf16>, vector<32x128xbf16>, vector<8x128xf32> -> vector<8x128xf32>
    %73 = arith.index_cast %c1_i32 : i32 to index
    %c0_25 = arith.constant 0 : index
    %c0_26 = arith.constant 0 : index
    %74 = vector.load %arg9[%73, %c0_25, %c0_26] : memref<4x8x128xf32, #tpu.memory_space<vmem>>, vector<1x8x128xf32>
    %75 = vector.shape_cast %74 : vector<1x8x128xf32> to vector<8x128xf32>
    %76 = vector.extract_strided_slice %75 {offsets = [0, 0], sizes = [8, 64], strides = [1, 1]} : vector<8x128xf32> to vector<8x64xf32>
    %77 = vector.extract_strided_slice %72 {offsets = [0, 0], sizes = [8, 64], strides = [1, 1]} : vector<8x128xf32> to vector<8x64xf32>
    %78 = arith.addf %76, %77 : vector<8x64xf32>
    %79 = arith.index_cast %69 : i32 to index
    %c0_27 = arith.constant 0 : index
    %c0_28 = arith.constant 0 : index
    %80 = vector.load %arg9[%79, %c0_27, %c0_28] : memref<4x8x128xf32, #tpu.memory_space<vmem>>, vector<1x8x128xf32>
    %81 = vector.shape_cast %80 : vector<1x8x128xf32> to vector<8x128xf32>
    %82 = vector.extract_strided_slice %81 {offsets = [0, 64], sizes = [8, 64], strides = [1, 1]} : vector<8x128xf32> to vector<8x64xf32>
    %83 = vector.extract_strided_slice %72 {offsets = [0, 64], sizes = [8, 64], strides = [1, 1]} : vector<8x128xf32> to vector<8x64xf32>
    %84 = arith.addf %82, %83 : vector<8x64xf32>
    %85 = vector.extract_strided_slice %78 {offsets = [0, 0], sizes = [8, 48], strides = [1, 1]} : vector<8x64xf32> to vector<8x48xf32>
    %86 = arith.negf %85 : vector<8x48xf32>
    %87 = math.exp %86 : vector<8x48xf32>
    %cst_29 = arith.constant 1.000000e+00 : f32
    %88 = vector.broadcast %cst_29 : f32 to vector<8x48xf32>
    %89 = arith.addf %88, %87 : vector<8x48xf32>
    %90 = arith.divf %88, %89 : vector<8x48xf32>
    %91 = vector.extract_strided_slice %78 {offsets = [0, 48], sizes = [8, 16], strides = [1, 1]} : vector<8x64xf32> to vector<8x16xf32>
    %92 = math.tanh %91 : vector<8x16xf32>
    %93 = vector.extract_strided_slice %90 {offsets = [0, 0], sizes = [8, 16], strides = [1, 1]} : vector<8x48xf32> to vector<8x16xf32>
    %94 = vector.extract_strided_slice %90 {offsets = [0, 16], sizes = [8, 16], strides = [1, 1]} : vector<8x48xf32> to vector<8x16xf32>
    %95 = vector.extract_strided_slice %90 {offsets = [0, 32], sizes = [8, 16], strides = [1, 1]} : vector<8x48xf32> to vector<8x16xf32>
    %96 = arith.mulf %94, %40 : vector<8x16xf32>
    %97 = arith.mulf %93, %92 : vector<8x16xf32>
    %98 = arith.addf %96, %97 : vector<8x16xf32>
    %99 = math.tanh %98 : vector<8x16xf32>
    %100 = arith.mulf %95, %99 : vector<8x16xf32>
    %101 = vector.extract_strided_slice %84 {offsets = [0, 0], sizes = [8, 48], strides = [1, 1]} : vector<8x64xf32> to vector<8x48xf32>
    %102 = arith.negf %101 : vector<8x48xf32>
    %103 = math.exp %102 : vector<8x48xf32>
    %cst_30 = arith.constant 1.000000e+00 : f32
    %104 = vector.broadcast %cst_30 : f32 to vector<8x48xf32>
    %105 = arith.addf %104, %103 : vector<8x48xf32>
    %106 = arith.divf %104, %105 : vector<8x48xf32>
    %107 = vector.extract_strided_slice %84 {offsets = [0, 48], sizes = [8, 16], strides = [1, 1]} : vector<8x64xf32> to vector<8x16xf32>
    %108 = math.tanh %107 : vector<8x16xf32>
    %109 = vector.extract_strided_slice %106 {offsets = [0, 0], sizes = [8, 16], strides = [1, 1]} : vector<8x48xf32> to vector<8x16xf32>
    %110 = vector.extract_strided_slice %106 {offsets = [0, 16], sizes = [8, 16], strides = [1, 1]} : vector<8x48xf32> to vector<8x16xf32>
    %111 = vector.extract_strided_slice %106 {offsets = [0, 32], sizes = [8, 16], strides = [1, 1]} : vector<8x48xf32> to vector<8x16xf32>
    %112 = arith.mulf %110, %56 : vector<8x16xf32>
    %113 = arith.mulf %109, %108 : vector<8x16xf32>
    %114 = arith.addf %112, %113 : vector<8x16xf32>
    %115 = math.tanh %114 : vector<8x16xf32>
    %116 = arith.mulf %111, %115 : vector<8x16xf32>
    %117 = arith.truncf %100 : vector<8x16xf32> to vector<8x16xbf16>
    %118 = arith.index_cast %c1_i32 : i32 to index
    %c0_31 = arith.constant 0 : index
    %c0_32 = arith.constant 0 : index
    %119 = vector.load %arg10[%118, %c0_31, %c0_32] : memref<4x8x16xbf16, #tpu.memory_space<vmem>>, vector<1x8x16xbf16>
    %120 = vector.shape_cast %119 : vector<1x8x16xbf16> to vector<8x16xbf16>
    %121 = vector.shape_cast %117 : vector<8x16xbf16> to vector<1x8x16xbf16>
    tpu.vector_store %arg10[%118, %c0_31, %c0_32], %121 {strides = array<i32>} : memref<4x8x16xbf16, #tpu.memory_space<vmem>>, vector<1x8x16xbf16>,
    %122 = arith.truncf %116 : vector<8x16xf32> to vector<8x16xbf16>
    %123 = arith.index_cast %69 : i32 to index
    %c0_33 = arith.constant 0 : index
    %c0_34 = arith.constant 0 : index
    %124 = vector.load %arg11[%123, %c0_33, %c0_34] : memref<4x8x16xbf16, #tpu.memory_space<vmem>>, vector<1x8x16xbf16>
    %125 = vector.shape_cast %124 : vector<1x8x16xbf16> to vector<8x16xbf16>
    %126 = vector.shape_cast %122 : vector<8x16xbf16> to vector<1x8x16xbf16>
    tpu.vector_store %arg11[%123, %c0_33, %c0_34], %126 {strides = array<i32>} : memref<4x8x16xbf16, #tpu.memory_space<vmem>>, vector<1x8x16xbf16>,
    %c2_i32 = arith.constant 2 : i32
    %c3_i32_35 = arith.constant 3 : i32
    %127 = arith.subi %c3_i32_35, %c2_i32 : i32
    %128 = tpu.concatenate %100, %116 in 1 : vector<8x16xf32>, vector<8x16xf32> -> vector<8x32xf32>
    %129 = arith.truncf %128 : vector<8x32xf32> to vector<8x32xbf16>
    %cst_36 = arith.constant dense<0.000000e+00> : vector<8x128xf32>
    %130 = tpu.matmul %129, %9, %cst_36 {dimension_numbers = #tpu.dot_dimension_numbers<[1], [0], [0], [1], [0, 0, 1, 1], [], []>} : vector<8x32xbf16>, vector<32x128xbf16>, vector<8x128xf32> -> vector<8x128xf32>
    %131 = arith.index_cast %c2_i32 : i32 to index
    %c0_37 = arith.constant 0 : index
    %c0_38 = arith.constant 0 : index
    %132 = vector.load %arg9[%131, %c0_37, %c0_38] : memref<4x8x128xf32, #tpu.memory_space<vmem>>, vector<1x8x128xf32>
    %133 = vector.shape_cast %132 : vector<1x8x128xf32> to vector<8x128xf32>
    %134 = vector.extract_strided_slice %133 {offsets = [0, 0], sizes = [8, 64], strides = [1, 1]} : vector<8x128xf32> to vector<8x64xf32>
    %135 = vector.extract_strided_slice %130 {offsets = [0, 0], sizes = [8, 64], strides = [1, 1]} : vector<8x128xf32> to vector<8x64xf32>
    %136 = arith.addf %134, %135 : vector<8x64xf32>
    %137 = arith.index_cast %127 : i32 to index
    %c0_39 = arith.constant 0 : index
    %c0_40 = arith.constant 0 : index
    %138 = vector.load %arg9[%137, %c0_39, %c0_40] : memref<4x8x128xf32, #tpu.memory_space<vmem>>, vector<1x8x128xf32>
    %139 = vector.shape_cast %138 : vector<1x8x128xf32> to vector<8x128xf32>
    %140 = vector.extract_strided_slice %139 {offsets = [0, 64], sizes = [8, 64], strides = [1, 1]} : vector<8x128xf32> to vector<8x64xf32>
    %141 = vector.extract_strided_slice %130 {offsets = [0, 64], sizes = [8, 64], strides = [1, 1]} : vector<8x128xf32> to vector<8x64xf32>
    %142 = arith.addf %140, %141 : vector<8x64xf32>
    %143 = vector.extract_strided_slice %136 {offsets = [0, 0], sizes = [8, 48], strides = [1, 1]} : vector<8x64xf32> to vector<8x48xf32>
    %144 = arith.negf %143 : vector<8x48xf32>
    %145 = math.exp %144 : vector<8x48xf32>
    %cst_41 = arith.constant 1.000000e+00 : f32
    %146 = vector.broadcast %cst_41 : f32 to vector<8x48xf32>
    %147 = arith.addf %146, %145 : vector<8x48xf32>
    %148 = arith.divf %146, %147 : vector<8x48xf32>
    %149 = vector.extract_strided_slice %136 {offsets = [0, 48], sizes = [8, 16], strides = [1, 1]} : vector<8x64xf32> to vector<8x16xf32>
    %150 = math.tanh %149 : vector<8x16xf32>
    %151 = vector.extract_strided_slice %148 {offsets = [0, 0], sizes = [8, 16], strides = [1, 1]} : vector<8x48xf32> to vector<8x16xf32>
    %152 = vector.extract_strided_slice %148 {offsets = [0, 16], sizes = [8, 16], strides = [1, 1]} : vector<8x48xf32> to vector<8x16xf32>
    %153 = vector.extract_strided_slice %148 {offsets = [0, 32], sizes = [8, 16], strides = [1, 1]} : vector<8x48xf32> to vector<8x16xf32>
    %154 = arith.mulf %152, %98 : vector<8x16xf32>
    %155 = arith.mulf %151, %150 : vector<8x16xf32>
    %156 = arith.addf %154, %155 : vector<8x16xf32>
    %157 = math.tanh %156 : vector<8x16xf32>
    %158 = arith.mulf %153, %157 : vector<8x16xf32>
    %159 = vector.extract_strided_slice %142 {offsets = [0, 0], sizes = [8, 48], strides = [1, 1]} : vector<8x64xf32> to vector<8x48xf32>
    %160 = arith.negf %159 : vector<8x48xf32>
    %161 = math.exp %160 : vector<8x48xf32>
    %cst_42 = arith.constant 1.000000e+00 : f32
    %162 = vector.broadcast %cst_42 : f32 to vector<8x48xf32>
    %163 = arith.addf %162, %161 : vector<8x48xf32>
    %164 = arith.divf %162, %163 : vector<8x48xf32>
    %165 = vector.extract_strided_slice %142 {offsets = [0, 48], sizes = [8, 16], strides = [1, 1]} : vector<8x64xf32> to vector<8x16xf32>
    %166 = math.tanh %165 : vector<8x16xf32>
    %167 = vector.extract_strided_slice %164 {offsets = [0, 0], sizes = [8, 16], strides = [1, 1]} : vector<8x48xf32> to vector<8x16xf32>
    %168 = vector.extract_strided_slice %164 {offsets = [0, 16], sizes = [8, 16], strides = [1, 1]} : vector<8x48xf32> to vector<8x16xf32>
    %169 = vector.extract_strided_slice %164 {offsets = [0, 32], sizes = [8, 16], strides = [1, 1]} : vector<8x48xf32> to vector<8x16xf32>
    %170 = arith.mulf %168, %114 : vector<8x16xf32>
    %171 = arith.mulf %167, %166 : vector<8x16xf32>
    %172 = arith.addf %170, %171 : vector<8x16xf32>
    %173 = math.tanh %172 : vector<8x16xf32>
    %174 = arith.mulf %169, %173 : vector<8x16xf32>
    %175 = arith.truncf %158 : vector<8x16xf32> to vector<8x16xbf16>
    %176 = arith.index_cast %c2_i32 : i32 to index
    %c0_43 = arith.constant 0 : index
    %c0_44 = arith.constant 0 : index
    %177 = vector.load %arg10[%176, %c0_43, %c0_44] : memref<4x8x16xbf16, #tpu.memory_space<vmem>>, vector<1x8x16xbf16>
    %178 = vector.shape_cast %177 : vector<1x8x16xbf16> to vector<8x16xbf16>
    %179 = vector.shape_cast %175 : vector<8x16xbf16> to vector<1x8x16xbf16>
    tpu.vector_store %arg10[%176, %c0_43, %c0_44], %179 {strides = array<i32>} : memref<4x8x16xbf16, #tpu.memory_space<vmem>>, vector<1x8x16xbf16>,
    %180 = arith.truncf %174 : vector<8x16xf32> to vector<8x16xbf16>
    %181 = arith.index_cast %127 : i32 to index
    %c0_45 = arith.constant 0 : index
    %c0_46 = arith.constant 0 : index
    %182 = vector.load %arg11[%181, %c0_45, %c0_46] : memref<4x8x16xbf16, #tpu.memory_space<vmem>>, vector<1x8x16xbf16>
    %183 = vector.shape_cast %182 : vector<1x8x16xbf16> to vector<8x16xbf16>
    %184 = vector.shape_cast %180 : vector<8x16xbf16> to vector<1x8x16xbf16>
    tpu.vector_store %arg11[%181, %c0_45, %c0_46], %184 {strides = array<i32>} : memref<4x8x16xbf16, #tpu.memory_space<vmem>>, vector<1x8x16xbf16>,
    %c3_i32_47 = arith.constant 3 : i32
    %c3_i32_48 = arith.constant 3 : i32
    %185 = arith.subi %c3_i32_48, %c3_i32_47 : i32
    %186 = tpu.concatenate %158, %174 in 1 : vector<8x16xf32>, vector<8x16xf32> -> vector<8x32xf32>
    %187 = arith.truncf %186 : vector<8x32xf32> to vector<8x32xbf16>
    %cst_49 = arith.constant dense<0.000000e+00> : vector<8x128xf32>
    %188 = tpu.matmul %187, %9, %cst_49 {dimension_numbers = #tpu.dot_dimension_numbers<[1], [0], [0], [1], [0, 0, 1, 1], [], []>} : vector<8x32xbf16>, vector<32x128xbf16>, vector<8x128xf32> -> vector<8x128xf32>
    %189 = arith.index_cast %c3_i32_47 : i32 to index
    %c0_50 = arith.constant 0 : index
    %c0_51 = arith.constant 0 : index
    %190 = vector.load %arg9[%189, %c0_50, %c0_51] : memref<4x8x128xf32, #tpu.memory_space<vmem>>, vector<1x8x128xf32>
    %191 = vector.shape_cast %190 : vector<1x8x128xf32> to vector<8x128xf32>
    %192 = vector.extract_strided_slice %191 {offsets = [0, 0], sizes = [8, 64], strides = [1, 1]} : vector<8x128xf32> to vector<8x64xf32>
    %193 = vector.extract_strided_slice %188 {offsets = [0, 0], sizes = [8, 64], strides = [1, 1]} : vector<8x128xf32> to vector<8x64xf32>
    %194 = arith.addf %192, %193 : vector<8x64xf32>
    %195 = arith.index_cast %185 : i32 to index
    %c0_52 = arith.constant 0 : index
    %c0_53 = arith.constant 0 : index
    %196 = vector.load %arg9[%195, %c0_52, %c0_53] : memref<4x8x128xf32, #tpu.memory_space<vmem>>, vector<1x8x128xf32>
    %197 = vector.shape_cast %196 : vector<1x8x128xf32> to vector<8x128xf32>
    %198 = vector.extract_strided_slice %197 {offsets = [0, 64], sizes = [8, 64], strides = [1, 1]} : vector<8x128xf32> to vector<8x64xf32>
    %199 = vector.extract_strided_slice %188 {offsets = [0, 64], sizes = [8, 64], strides = [1, 1]} : vector<8x128xf32> to vector<8x64xf32>
    %200 = arith.addf %198, %199 : vector<8x64xf32>
    %201 = vector.extract_strided_slice %194 {offsets = [0, 0], sizes = [8, 48], strides = [1, 1]} : vector<8x64xf32> to vector<8x48xf32>
    %202 = arith.negf %201 : vector<8x48xf32>
    %203 = math.exp %202 : vector<8x48xf32>
    %cst_54 = arith.constant 1.000000e+00 : f32
    %204 = vector.broadcast %cst_54 : f32 to vector<8x48xf32>
    %205 = arith.addf %204, %203 : vector<8x48xf32>
    %206 = arith.divf %204, %205 : vector<8x48xf32>
    %207 = vector.extract_strided_slice %194 {offsets = [0, 48], sizes = [8, 16], strides = [1, 1]} : vector<8x64xf32> to vector<8x16xf32>
    %208 = math.tanh %207 : vector<8x16xf32>
    %209 = vector.extract_strided_slice %206 {offsets = [0, 0], sizes = [8, 16], strides = [1, 1]} : vector<8x48xf32> to vector<8x16xf32>
    %210 = vector.extract_strided_slice %206 {offsets = [0, 16], sizes = [8, 16], strides = [1, 1]} : vector<8x48xf32> to vector<8x16xf32>
    %211 = vector.extract_strided_slice %206 {offsets = [0, 32], sizes = [8, 16], strides = [1, 1]} : vector<8x48xf32> to vector<8x16xf32>
    %212 = arith.mulf %210, %156 : vector<8x16xf32>
    %213 = arith.mulf %209, %208 : vector<8x16xf32>
    %214 = arith.addf %212, %213 : vector<8x16xf32>
    %215 = math.tanh %214 : vector<8x16xf32>
    %216 = arith.mulf %211, %215 : vector<8x16xf32>
    %217 = vector.extract_strided_slice %200 {offsets = [0, 0], sizes = [8, 48], strides = [1, 1]} : vector<8x64xf32> to vector<8x48xf32>
    %218 = arith.negf %217 : vector<8x48xf32>
    %219 = math.exp %218 : vector<8x48xf32>
    %cst_55 = arith.constant 1.000000e+00 : f32
    %220 = vector.broadcast %cst_55 : f32 to vector<8x48xf32>
    %221 = arith.addf %220, %219 : vector<8x48xf32>
    %222 = arith.divf %220, %221 : vector<8x48xf32>
    %223 = vector.extract_strided_slice %200 {offsets = [0, 48], sizes = [8, 16], strides = [1, 1]} : vector<8x64xf32> to vector<8x16xf32>
    %224 = math.tanh %223 : vector<8x16xf32>
    %225 = vector.extract_strided_slice %222 {offsets = [0, 0], sizes = [8, 16], strides = [1, 1]} : vector<8x48xf32> to vector<8x16xf32>
    %226 = vector.extract_strided_slice %222 {offsets = [0, 16], sizes = [8, 16], strides = [1, 1]} : vector<8x48xf32> to vector<8x16xf32>
    %227 = vector.extract_strided_slice %222 {offsets = [0, 32], sizes = [8, 16], strides = [1, 1]} : vector<8x48xf32> to vector<8x16xf32>
    %228 = arith.mulf %226, %172 : vector<8x16xf32>
    %229 = arith.mulf %225, %224 : vector<8x16xf32>
    %230 = arith.addf %228, %229 : vector<8x16xf32>
    %231 = math.tanh %230 : vector<8x16xf32>
    %232 = arith.mulf %227, %231 : vector<8x16xf32>
    %233 = arith.truncf %216 : vector<8x16xf32> to vector<8x16xbf16>
    %234 = arith.index_cast %c3_i32_47 : i32 to index
    %c0_56 = arith.constant 0 : index
    %c0_57 = arith.constant 0 : index
    %235 = vector.load %arg10[%234, %c0_56, %c0_57] : memref<4x8x16xbf16, #tpu.memory_space<vmem>>, vector<1x8x16xbf16>
    %236 = vector.shape_cast %235 : vector<1x8x16xbf16> to vector<8x16xbf16>
    %237 = vector.shape_cast %233 : vector<8x16xbf16> to vector<1x8x16xbf16>
    tpu.vector_store %arg10[%234, %c0_56, %c0_57], %237 {strides = array<i32>} : memref<4x8x16xbf16, #tpu.memory_space<vmem>>, vector<1x8x16xbf16>,
    %238 = arith.truncf %232 : vector<8x16xf32> to vector<8x16xbf16>
    %239 = arith.index_cast %185 : i32 to index
    %c0_58 = arith.constant 0 : index
    %c0_59 = arith.constant 0 : index
    %240 = vector.load %arg11[%239, %c0_58, %c0_59] : memref<4x8x16xbf16, #tpu.memory_space<vmem>>, vector<1x8x16xbf16>
    %241 = vector.shape_cast %240 : vector<1x8x16xbf16> to vector<8x16xbf16>
    %242 = vector.shape_cast %238 : vector<8x16xbf16> to vector<1x8x16xbf16>
    tpu.vector_store %arg11[%239, %c0_58, %c0_59], %242 {strides = array<i32>} : memref<4x8x16xbf16, #tpu.memory_space<vmem>>, vector<1x8x16xbf16>,
    %c4_i32 = arith.constant 4 : i32
    %c0_60 = arith.constant 0 : index
    %c0_61 = arith.constant 0 : index
    %c0_62 = arith.constant 0 : index
    %243 = vector.load %arg10[%c0_60, %c0_61, %c0_62] : memref<4x8x16xbf16, #tpu.memory_space<vmem>>, vector<4x8x16xbf16>
    %244 = vector.shape_cast %243 : vector<4x8x16xbf16> to vector<32x16xbf16>
    %c0_63 = arith.constant 0 : index
    %c0_64 = arith.constant 0 : index
    %c0_65 = arith.constant 0 : index
    %245 = vector.load %arg11[%c0_63, %c0_64, %c0_65] : memref<4x8x16xbf16, #tpu.memory_space<vmem>>, vector<4x8x16xbf16>
    %246 = vector.shape_cast %245 : vector<4x8x16xbf16> to vector<32x16xbf16>
    %c0_66 = arith.constant 0 : index
    %c0_67 = arith.constant 0 : index
    %247 = vector.load %arg5[%c0_66, %c0_67] : memref<16x128xbf16, #tpu.memory_space<vmem>>, vector<16x128xbf16>
    %cst_68 = arith.constant dense<0.000000e+00> : vector<32x128xf32>
    %248 = tpu.matmul %244, %247, %cst_68 {dimension_numbers = #tpu.dot_dimension_numbers<[1], [0], [0], [1], [0, 0, 1, 1], [], []>} : vector<32x16xbf16>, vector<16x128xbf16>, vector<32x128xf32> -> vector<32x128xf32>
    %c0_69 = arith.constant 0 : index
    %c0_70 = arith.constant 0 : index
    %249 = vector.load %arg6[%c0_69, %c0_70] : memref<16x128xbf16, #tpu.memory_space<vmem>>, vector<16x128xbf16>
    %cst_71 = arith.constant dense<0.000000e+00> : vector<32x128xf32>
    %250 = tpu.matmul %246, %249, %cst_71 {dimension_numbers = #tpu.dot_dimension_numbers<[1], [0], [0], [1], [0, 0, 1, 1], [], []>} : vector<32x16xbf16>, vector<16x128xbf16>, vector<32x128xf32> -> vector<32x128xf32>
    %251 = arith.addf %248, %250 : vector<32x128xf32>
    %c0_72 = arith.constant 0 : index
    %c0_73 = arith.constant 0 : index
    %252 = vector.load %arg7[%c0_72, %c0_73] : memref<1x128xf32, #tpu.memory_space<vmem>>, vector<1x128xf32>
    %253 = vector.broadcast %252 : vector<1x128xf32> to vector<32x128xf32>
    %254 = arith.addf %251, %253 : vector<32x128xf32>
    %255 = vector.shape_cast %254 : vector<32x128xf32> to vector<4x8x128xf32>
    %c0_74 = arith.constant 0 : index
    %c0_75 = arith.constant 0 : index
    %c0_76 = arith.constant 0 : index
    %256 = vector.load %arg8[%c0_74, %c0_75, %c0_76] : memref<4x8x128xf32, #tpu.memory_space<vmem>>, vector<4x8x128xf32>
    tpu.vector_store %arg8[%c0_74, %c0_75, %c0_76], %255 {strides = array<i32>} : memref<4x8x128xf32, #tpu.memory_space<vmem>>, vector<4x8x128xf32>,
    return
  }
  func.func @transform_0(%arg0: i32) -> (i32, i32, i32) {
    %c0_i32 = arith.constant 0 : i32
    %c0_i32_0 = arith.constant 0 : i32
    %c0_i32_1 = arith.constant 0 : i32
    return %c0_i32, %arg0, %c0_i32_0 : i32, i32, i32
  }
  func.func @transform_1(%arg0: i32) -> (i32, i32) {
    %c0_i32 = arith.constant 0 : i32
    %c0_i32_0 = arith.constant 0 : i32
    %c0_i32_1 = arith.constant 0 : i32
    return %c0_i32, %c0_i32_0 : i32, i32
  }
  func.func @transform_2(%arg0: i32) -> (i32, i32) {
    %c0_i32 = arith.constant 0 : i32
    %c0_i32_0 = arith.constant 0 : i32
    %c0_i32_1 = arith.constant 0 : i32
    return %c0_i32, %c0_i32_0 : i32, i32
  }
  func.func @transform_3(%arg0: i32) -> (i32, i32) {
    %c0_i32 = arith.constant 0 : i32
    %c0_i32_0 = arith.constant 0 : i32
    %c0_i32_1 = arith.constant 0 : i32
    return %c0_i32, %c0_i32_0 : i32, i32
  }
  func.func @transform_4(%arg0: i32) -> (i32, i32) {
    %c0_i32 = arith.constant 0 : i32
    %c0_i32_0 = arith.constant 0 : i32
    %c0_i32_1 = arith.constant 0 : i32
    return %c0_i32, %c0_i32_0 : i32, i32
  }
  func.func @transform_5(%arg0: i32) -> (i32, i32) {
    %c0_i32 = arith.constant 0 : i32
    %c0_i32_0 = arith.constant 0 : i32
    %c0_i32_1 = arith.constant 0 : i32
    return %c0_i32, %c0_i32_0 : i32, i32
  }
  func.func @transform_6(%arg0: i32) -> (i32, i32) {
    %c0_i32 = arith.constant 0 : i32
    %c0_i32_0 = arith.constant 0 : i32
    %c0_i32_1 = arith.constant 0 : i32
    return %c0_i32, %c0_i32_0 : i32, i32
  }
  func.func @transform_7(%arg0: i32) -> (i32, i32, i32) {
    %c0_i32 = arith.constant 0 : i32
    %c0_i32_0 = arith.constant 0 : i32
    %c0_i32_1 = arith.constant 0 : i32
    return %c0_i32, %arg0, %c0_i32_0 : i32, i32, i32
  }
}

</mosaic_0001>

<bundles_post_ra>
// kernel: tpu_custom_call.1
= control target key start
LH: loop header
LB: loop body
LE: loop exit
PB: predicated region body
PF: predicated region fallthrough
CT: control target
= control target key end

     0   :  { %12 = vsyncpa [#allocation6], 0  ;;  %s1410_s0 = inlined_call_operand.hbm [shape: bf16[4,8,32], index: 0, kind: input, shape index: {}]   ;;  %s1411_s1 = inlined_call_operand.hbm [shape: bf16[32,128], index: 1, kind: input, shape index: {}]   ;;  %s1412_s2 = inlined_call_operand.vmem [shape: f32[1,128], index: 2, kind: input, shape index: {}]   ;;  %s1413_s3 = inlined_call_operand.hbm [shape: bf16[32,128], index: 3, kind: input, shape index: {}]   ;;  %s1414_s4 = inlined_call_operand.hbm [shape: bf16[16,128], index: 4, kind: input, shape index: {}]   ;;  %s1415_s5 = inlined_call_operand.vmem [shape: bf16[16,128], index: 5, kind: input, shape index: {}]   ;;  %s1416_s6 = inlined_call_operand.vmem [shape: f32[1,128], index: 6, kind: input, shape index: {}]   ;;  %s1417_s7 = inlined_call_operand.hbm [shape: f32[4,8,128], index: 7, kind: output, shape index: {}]  }
   0x1   :  { %13 = vsyncpa [#allocation9], 0 }
   0x2   :  { %14 = vsyncpa [#allocation12], 0 }
   0x3   :  { %15 = vsyncpa [#allocation7], 0  ;;  %s1192_s24 = smov [#allocation8]   ;;  %s1193_s26 = smov [#allocation5]  }
   0x4   :  { %s33_s25 = sshll.u32 %s1192_s24, 4  ;;  %s21_s27 = sshll.u32 %s1193_s26, 4  ;;  %s34_s25 = int_to_ptr.vmem [resolvable:$true] %s33_s25  ;;  %s22_s27 = int_to_ptr.vmem [resolvable:$true] %s21_s27 }
   0x5   :  { %s1092_s28 = scalar_lea.vmem %s34_s25, 256  ;;  %p1097_p1 = scmp.lt.s32.totalorder %s34_s25, %s34_s25 }
   0x6   :  { %p1093_p0 = scmp.ne.s32.totalorder %s34_s25, %s1092_s28  ;;  %p1098_p2 = scmp.lt.s32.totalorder %s1092_s28, %s1092_s28 }
   0x8   :  { %p1099_p3 = por %p1098_p2, %p1097_p1 }
   0xa   :  { %p1100_p4 = pnand %p1099_p3, %p1093_p0 }
   0xc   :  { %1103 = shalt.err (!%p1100_p4)
}
   0xd   :  { %s1194_s29 = smov 64   ;;  %s1195_s30 = smov 4  }
   0xe   :  { %39 = dma.hbm_to_vmem [thread:$0]  %s1411_s1, 256, %s34_s25, [#allocation9], %s1194_s29, %s1194_s29, %s1195_s30  }
   0xf   :  { %s1112_s10 = scalar_lea.vmem %s22_s27, 256  ;;  %p1117_p6 = scmp.lt.s32.totalorder %s22_s27, %s22_s27 }
  0x10   :  { %p1113_p5 = scmp.ne.s32.totalorder %s22_s27, %s1112_s10  ;;  %p1118_p7 = scmp.lt.s32.totalorder %s1112_s10, %s1112_s10 }
  0x12   :  { %p1119_p8 = por %p1118_p7, %p1117_p6 }
  0x14   :  { %p1120_p9 = pnand %p1119_p8, %p1113_p5 }
  0x16   :  { %1123 = shalt.err (!%p1120_p9)
}
  0x17   :  { %27 = dma.hbm_to_vmem [thread:$0]  %s1410_s0, 256, %s22_s27, [#allocation6], %s1194_s29, %s1194_s29, %s1195_s30  }
  0x18   :  { %s1196_s13 = smov [#allocation10]   ;;  %s1197_s15 = smov [#allocation11]  }
  0x19   :  { %s47_s14 = sshll.u32 %s1196_s13, 4  ;;  %s59_s16 = sshll.u32 %s1197_s15, 4  ;;  %s48_s14 = int_to_ptr.vmem [resolvable:$true] %s47_s14  ;;  %s60_s16 = int_to_ptr.vmem [resolvable:$true] %s59_s16 }
  0x1a   :  { %s1132_s1 = scalar_lea.vmem %s48_s14, 256  ;;  %p1137_p11 = scmp.lt.s32.totalorder %s48_s14, %s48_s14 }
  0x1b   :  { %p1133_p10 = scmp.ne.s32.totalorder %s48_s14, %s1132_s1  ;;  %p1138_p12 = scmp.lt.s32.totalorder %s1132_s1, %s1132_s1 }
  0x1d   :  { %p1139_p13 = por %p1138_p12, %p1137_p11 }
  0x1f   :  { %p1140_p0 = pnand %p1139_p13, %p1133_p10 }
  0x21   :  { %1143 = shalt.err (!%p1140_p0)
}
  0x22   :  { %53 = dma.hbm_to_vmem [thread:$0]  %s1413_s3, 256, %s48_s14, [#allocation9], %s1194_s29, %s1194_s29, %s1195_s30  }
  0x23   :  { %s1152_s0 = scalar_lea.vmem %s60_s16, 128  ;;  %p1157_p2 = scmp.lt.s32.totalorder %s60_s16, %s60_s16 }
  0x24   :  { %p1153_p1 = scmp.ne.s32.totalorder %s60_s16, %s1152_s0  ;;  %p1158_p3 = scmp.lt.s32.totalorder %s1152_s0, %s1152_s0 }
  0x26   :  { %p1159_p4 = por %p1158_p3, %p1157_p2 }
  0x28   :  { %p1160_p5 = pnand %p1159_p4, %p1153_p1 }
  0x2a   :  { %1163 = shalt.err (!%p1160_p5)
}
  0x2b   :  { %65 = dma.hbm_to_vmem [thread:$0]  %s1414_s4, 128, %s60_s16, [#allocation12], %s1194_s29, %s1194_s29, %s1195_s30  }
  0x2c   :  { %1184 = dma.done.wait [#allocation6], 256  }
  0x2d   :  { %1185 = vsyncadd [#allocation6], 4294967040 }
  0x2e   :  { %1186 = dma.done.wait [#allocation9], 512  }
  0x2f   :  { %1187 = vsyncadd [#allocation9], 4294966784 }
  0x30   :  { %1188 = dma.done.wait [#allocation12], 128  }
  0x31   :  { %1189 = vsyncadd [#allocation12], 4294967168  ;;  %v1198_v0 = vmov 0.0   ;;  %vm1199_vm0 = vmmov 0   ;;  %v1008_v1 = vld [vmem:[#allocation8 + $0x8] sm:$0xff]   ;;  %v1276_v2 = vld [vmem:[#allocation10 + $0x8] sm:$0xff]  }
  0x32   :  { %947 = vmatprep.subr.bf16.mxu1 %v1198_v0  ;;  %951 = vmatprep.mubr.msk.bf16.mxu1 %vm1199_vm0, %v1198_v0  ;;  %v1010_v3 = vld [vmem:[#allocation8] sm:$0xff]   ;;  %v1279_v4 = vld [vmem:[#allocation10] sm:$0xff]   ;;  %vm120_vm1 = vcmask 261120   ;;  %v1013_v6 = vld [vmem:[#allocation5 + $0x8] sm:$0xff]   ;;  %v1200_v7 = vmov 0.0|0.0   ;;  %s1202_s21 = smov 16  }
  0x33   :  { %939 = vmatprep.subr.bf16.mxu0 %v1008_v1  ;;  %948 = vmatpush3.bf16.msra.mxu1 %v1276_v2  ;;  %v1012_v5 = vld [vmem:[#allocation5] sm:$0xff]   ;;  %s1203_s22 = smov 96   ;;  %s1204_s23 = smov 48   ;;  %vm319_vm2 = vcmask 130048   ;;  %vm300_vm3 = vcmask 125952  }
  0x34   :  { %940 = vmatpush3.bf16.msra.mxu0 %v1008_v1  ;;  %949 = vmatprep.subr.bf16.mxu1 %v1198_v0  ;;  %v1301_v8 = vld [vmem:[%s1412_s2] ss:$0 sm:$0xff]  ;;  %s1201_s2 = smov 80   ;;  %s1205_s24 = smov 32  }
  0x35   :  { %941 = vmatprep.subr.bf16.mxu0 %v1010_v3  ;;  %943 = vmatprep.mubr.msk.bf16.mxu0 %vm120_vm1, %v1012_v5  ;;  %s1206_s28 = smov [#allocation13]  }
  0x36   :  { %s856_s29 = sshll.u32 %s1206_s28, 4  ;;  %s857_s29 = int_to_ptr.vmem [resolvable:$true] %s856_s29 }
  0x37   :  { %950 = vmatpush3.bf16.msra.mxu1 %v1279_v4  ;;  %p1169_p7 = scmp.lt.s32.totalorder %s857_s29, %s857_s29 }
  0x38   :  { %942 = vmatpush3.bf16.msra.mxu0 %v1010_v3  ;;  %963 = vmatprep.subr.bf16.mxu1 %v1198_v0 }
  0x39   :  { %955 = vmatprep.subr.bf16.mxu0 %v1198_v0 }
  0x3a   :  { %952 = vmatmul.mubr.bf16.vlgmr.msra.gmra.mxu1 %v1200_v7 }
  0x3b   :  { %944 = vmatmul.mubr.msk.bf16.vlgmr.msra.gmra.mxu0 %vm120_vm1, %v1013_v6  ;;  %964 = vmatpush3.bf16.msra.mxu1 %v1276_v2 }
  0x3c   :  { %956 = vmatpush3.bf16.msra.mxu0 %v1276_v2  ;;  %959 = vmatprep.mubr.msk.bf16.mxu0 %vm1199_vm0, %v1198_v0 }
  0x3d   :  { %957 = vmatprep.subr.bf16.mxu0 %v1198_v0  ;;  %965 = vmatprep.subr.bf16.mxu1 %v1198_v0 }
  0x3e   :  { %967 = vmatprep.mubr.msk.bf16.mxu1 %vm1199_vm0, %v1198_v0 }
  0x3f   :  { %966 = vmatpush3.bf16.msra.mxu1 %v1279_v4 }
  0x40   :  { %958 = vmatpush3.bf16.msra.mxu0 %v1279_v4 }
  0x41   :  { %971 = vmatprep.subr.bf16.mxu0 %v1198_v0 }
  0xfa   :  { %v234_v9 = vpop.f32.mrf.mxu1 }
  0xfb   :  { %v945_v10 = vpop.f32.mrf.mxu0 }
  0xfc   :  { %v1304_v11 = vadd.f32 %v945_v10, %v1301_v8  ;;  %v953_v12 = vpop.f32.mrf.mxu1 }
  0xfd   :  { %v161_v13 = vpop.f32.mrf.mxu0 }
  0xfe   :  { %v1307_v14 = vadd.f32 %v1301_v8, %v161_v13  ;;  %v237_v15 = vpop.f32.mrf.mxu1 }
  0xff   :  { %v946_v16 = vpop.f32.mrf.mxu0 }
 0x100   :  { %v241_v17 = vadd.f32 %v234_v9, %v1307_v14  ;;  %v1311_v18 = vadd.f32 %v946_v16, %v1301_v8  ;;  %v954_v19 = vpop.f32.mrf.mxu1 }
 0x101   :  { %v164_v51 = vpop.f32.mrf.mxu0 }
 0x102   :  { %1020 = vtanh.f32 %v241_v17  ;;  %v244_v20 = vadd.f32 %v234_v9, %v1311_v18  ;;  %v879_v23 = vmul.f32 -1.442695, %v241_v17  ;;  %v165_v52 = vadd.f32 %v1301_v8, %v164_v51 }
 0x104   :  { %1022 = vtanh.f32 %v244_v20  ;;  %v880_v24 = vmul.f32 -1.442695, %v244_v20 }
 0x105   :  { %1024 = vpow2.f32 %v879_v23 }
 0x106   :  { %1026 = vpow2.f32 %v880_v24 }
 0x10f   :  { %v1021_v21 = vpop.eup %1020 }
 0x110   :  { %254 = vrot.lane.b32.xlu0 %v1021_v21, %s1201_s2 }
 0x111   :  { %v1023_v22 = vpop.eup %1022 }
 0x112   :  { %v1025_v25 = vpop.eup %1024 }
 0x113   :  { %v248_v26 = vadd.f32 1.0, %v1025_v25  ;;  %v1027_v27 = vpop.eup %1026 }
 0x114   :  { %278 = vrot.lane.b32.xlu0 %v1023_v22, %s1201_s2  ;;  %v272_v28 = vadd.f32 1.0, %v1027_v27 }
 0x115   :  { %1028 = vrcp.f32 %v248_v26 }
 0x116   :  { %1030 = vrcp.f32 %v272_v28 }
 0x122   :  { %v1029_v29 = vpop.eup %1028 }
 0x123   :  { %v1031_v32 = vpop.eup %1030  ;;  %v252_v35 = vmul.f32 0.0, %v1029_v29 }
 0x124   :  { %v276_v38 = vmul.f32 0.0, %v1031_v32 }
 0x182   :  { %v255_v30 = vpop.permute.xlu0 %254 }
 0x183   :  { %v257_v31 = vmul.f32 %v1029_v29, %v255_v30 }
 0x185   :  { %259 = vrot.lane.b32.xlu1 %v257_v31, %s1202_s21 }
 0x186   :  { %v279_v33 = vpop.permute.xlu0 %278 }
 0x187   :  { %v281_v34 = vmul.f32 %v1031_v32, %v279_v33 }
 0x189   :  { %283 = vrot.lane.b32.xlu1 %v281_v34, %s1202_s21 }
 0x1f7   :  { %v260_v36 = vpop.permute.xlu1 %259 }
 0x1f8   :  { %v262_v37 = vadd.f32 %v260_v36, %v252_v35 }
 0x1fa   :  { %1032 = vtanh.f32 %v262_v37 }
 0x1fb   :  { %v284_v39 = vpop.permute.xlu1 %283 }
 0x1fc   :  { %v286_v40 = vadd.f32 %v284_v39, %v276_v38 }
 0x1fe   :  { %1034 = vtanh.f32 %v286_v40 }
 0x207   :  { %v1033_v41 = vpop.eup %1032 }
 0x208   :  { %265 = vrot.lane.b32.xlu0 %v1033_v41, %s1202_s21 }
 0x20b   :  { %v1035_v42 = vpop.eup %1034 }
 0x20c   :  { %289 = vrot.lane.b32.xlu1 %v1035_v42, %s1202_s21 }
 0x27a   :  { %v266_v43 = vpop.permute.xlu0 %265 }
 0x27b   :  { %v1320_v44 = vmul.f32 %v1029_v29, %v266_v43 }
 0x27d   :  { %312 = vrot.lane.b32.xlu0 %v1320_v44, %s1203_s22 }
 0x27e   :  { %v290_v45 = vpop.permute.xlu1 %289 }
 0x27f   :  { %v1324_v46 = vmul.f32 %v1031_v32, %v290_v45 }
 0x281   :  { %316 = vrot.lane.b32.xlu1 %v1324_v46, %s1204_s23 }
 0x2ef   :  { %v313_v47 = vpop.permute.xlu0 %312 }
 0x2f3   :  { %v317_v48 = vpop.permute.xlu1 %316 }
 0x2f4   :  { %v320_v49 = vsel %vm319_vm2, %v313_v47, %v317_v48 }
 0x2f5   :  { %v321_v50 = vpack.c.bf16 %v320_v49, %v320_v49 }
 0x2f7   :  { %960 = vmatmul.mubr.msk.bf16.vlgmr.msra.gmra.mxu0 %vm120_vm1, %v321_v50 }
 0x2f8   :  { %972 = vmatpush3.bf16.msra.mxu0 %v1276_v2  ;;  %975 = vmatprep.mubr.msk.bf16.mxu0 %vm1199_vm0, %v1198_v0 }
 0x2f9   :  { %973 = vmatprep.subr.bf16.mxu0 %v1198_v0 }
 0x2fc   :  { %974 = vmatpush3.bf16.msra.mxu0 %v1279_v4 }
 0x3b7   :  { %v359_v53 = vpop.f32.mrf.mxu0 }
 0x3b8   :  { %v367_v54 = vadd.f32 %v359_v53, %v165_v52  ;;  %v370_v55 = vadd.f32 %v359_v53, %v1304_v11 }
 0x3b9   :  { %v961_v56 = vpop.f32.mrf.mxu0 }
 0x3ba   :  { %1036 = vtanh.f32 %v367_v54  ;;  %v884_v61 = vmul.f32 -1.442695, %v367_v54  ;;  %v885_v62 = vmul.f32 -1.442695, %v370_v55 }
 0x3bb   :  { %1038 = vtanh.f32 %v370_v55  ;;  %v362_v57 = vpop.f32.mrf.mxu0 }
 0x3bc   :  { %1040 = vpow2.f32 %v884_v61 }
 0x3bd   :  { %v962_v58 = vpop.f32.mrf.mxu0  ;;  %1042 = vpow2.f32 %v885_v62 }
 0x3c7   :  { %v1037_v59 = vpop.eup %1036 }
 0x3c8   :  { %v1039_v60 = vpop.eup %1038  ;;  %380 = vrot.lane.b32.xlu0 %v1037_v59, %s1201_s2 }
 0x3c9   :  { %404 = vrot.lane.b32.xlu1 %v1039_v60, %s1201_s2  ;;  %v1041_v63 = vpop.eup %1040 }
 0x3ca   :  { %v1043_v0 = vpop.eup %1042  ;;  %v374_v1 = vadd.f32 1.0, %v1041_v63 }
 0x3cb   :  { %v398_v2 = vadd.f32 1.0, %v1043_v0 }
 0x3cc   :  { %1044 = vrcp.f32 %v374_v1 }
 0x3cd   :  { %1046 = vrcp.f32 %v398_v2 }
 0x3d9   :  { %v1045_v3 = vpop.eup %1044 }
 0x3da   :  { %v1047_v5 = vpop.eup %1046  ;;  %v378_v9 = vmul.f32 %v1045_v3, %v262_v37 }
 0x3db   :  { %v402_v10 = vmul.f32 %v1047_v5, %v286_v40 }
 0x43a   :  { %v381_v4 = vpop.permute.xlu0 %380 }
 0x43b   :  { %v405_v6 = vpop.permute.xlu1 %404  ;;  %v383_v7 = vmul.f32 %v1045_v3, %v381_v4 }
 0x43c   :  { %v407_v8 = vmul.f32 %v1047_v5, %v405_v6 }
 0x43d   :  { %385 = vrot.lane.b32.xlu0 %v383_v7, %s1202_s21 }
 0x43e   :  { %409 = vrot.lane.b32.xlu1 %v407_v8, %s1202_s21 }
 0x4af   :  { %v386_v12 = vpop.permute.xlu0 %385 }
 0x4b0   :  { %v410_v13 = vpop.permute.xlu1 %409  ;;  %v388_v15 = vadd.f32 %v386_v12, %v378_v9 }
 0x4b1   :  { %v412_v16 = vadd.f32 %v410_v13, %v402_v10 }
 0x4b2   :  { %1048 = vtanh.f32 %v388_v15 }
 0x4b3   :  { %1050 = vtanh.f32 %v412_v16 }
 0x4bf   :  { %v1049_v17 = vpop.eup %1048 }
 0x4c0   :  { %v1051_v19 = vpop.eup %1050  ;;  %391 = vrot.lane.b32.xlu0 %v1049_v17, %s1202_s21 }
 0x4c1   :  { %415 = vrot.lane.b32.xlu1 %v1051_v19, %s1202_s21 }
 0x532   :  { %v392_v20 = vpop.permute.xlu0 %391 }
 0x533   :  { %v416_v21 = vpop.permute.xlu1 %415  ;;  %v1343_v22 = vmul.f32 %v1045_v3, %v392_v20 }
 0x534   :  { %v1345_v23 = vmul.f32 %v1047_v5, %v416_v21 }
 0x535   :  { %438 = vrot.lane.b32.xlu0 %v1343_v22, %s1203_s22 }
 0x536   :  { %442 = vrot.lane.b32.xlu1 %v1345_v23, %s1204_s23 }
 0x5a7   :  { %v439_v24 = vpop.permute.xlu0 %438 }
 0x5a8   :  { %v443_v25 = vpop.permute.xlu1 %442 }
 0x5a9   :  { %v445_v26 = vsel %vm319_vm2, %v439_v24, %v443_v25 }
 0x5aa   :  { %v446_v27 = vpack.c.bf16 %v445_v26, %v445_v26 }
 0x5ac   :  { %968 = vmatmul.mubr.msk.bf16.vlgmr.msra.gmra.mxu1 %vm120_vm1, %v446_v27 }
 0x66c   :  { %v484_v28 = vpop.f32.mrf.mxu1 }
 0x66d   :  { %v491_v29 = vadd.f32 %v484_v28, %v1304_v11  ;;  %v493_v30 = vadd.f32 %v484_v28, %v165_v52 }
 0x66e   :  { %v969_v31 = vpop.f32.mrf.mxu1 }
 0x66f   :  { %1052 = vtanh.f32 %v491_v29  ;;  %v889_v36 = vmul.f32 -1.442695, %v491_v29  ;;  %v890_v37 = vmul.f32 -1.442695, %v493_v30 }
 0x670   :  { %1054 = vtanh.f32 %v493_v30  ;;  %v487_v32 = vpop.f32.mrf.mxu1 }
 0x671   :  { %1056 = vpow2.f32 %v889_v36  ;;  %v911_v32 = vpack.c.bf16 %v1343_v22, %v1343_v22  ;;  %v910_v36 = vpack.c.bf16 %v1324_v46, %v1324_v46 }
 0x672   :  { %v970_v33 = vpop.f32.mrf.mxu1  ;;  %1058 = vpow2.f32 %v890_v37  ;;  %v1016_v37 = vld [vmem:[#allocation11] sm:$0xff]  }
 0x673   :  { %v909_v33 = vpack.c.bf16 %v1320_v44, %v1320_v44  ;;  %v1015_v44 = vld [vmem:[%s1415_s5] sm:$0xff]   ;;  %985 = vmatprep.subr.bf16.mxu0 %v1016_v37 }
 0x674   :  { %979 = vmatprep.subr.bf16.mxu1 %v1015_v44 }
 0x675   :  { %980 = vmatpush3.bf16.msra.mxu1 %v1015_v44 }
 0x67c   :  { %v1053_v34 = vpop.eup %1052 }
 0x67d   :  { %v1055_v35 = vpop.eup %1054  ;;  %503 = vrot.lane.b32.xlu0 %v1053_v34, %s1201_s2  ;;  %v912_v34 = vpack.c.bf16 %v1345_v23, %v1345_v23 }
 0x67e   :  { %527 = vrot.lane.b32.xlu1 %v1055_v35, %s1201_s2  ;;  %v1057_v38 = vpop.eup %1056 }
 0x67f   :  { %v1059_v39 = vpop.eup %1058  ;;  %v497_v40 = vadd.f32 1.0, %v1057_v38 }
 0x680   :  { %v521_v11 = vadd.f32 1.0, %v1059_v39 }
 0x681   :  { %1060 = vrcp.f32 %v497_v40 }
 0x682   :  { %1062 = vrcp.f32 %v521_v11 }
 0x68e   :  { %v1061_v41 = vpop.eup %1060 }
 0x68f   :  { %v1063_v43 = vpop.eup %1062  ;;  %v501_v49 = vmul.f32 %v1061_v41, %v388_v15 }
 0x690   :  { %v525_v50 = vmul.f32 %v1063_v43, %v412_v16 }
 0x6ef   :  { %v504_v42 = vpop.permute.xlu0 %503 }
 0x6f0   :  { %v528_v45 = vpop.permute.xlu1 %527  ;;  %v506_v47 = vmul.f32 %v1061_v41, %v504_v42 }
 0x6f1   :  { %v530_v48 = vmul.f32 %v1063_v43, %v528_v45 }
 0x6f2   :  { %508 = vrot.lane.b32.xlu0 %v506_v47, %s1202_s21 }
 0x6f3   :  { %532 = vrot.lane.b32.xlu1 %v530_v48, %s1202_s21 }
 0x764   :  { %v509_v51 = vpop.permute.xlu0 %508 }
 0x765   :  { %v533_v52 = vpop.permute.xlu1 %532  ;;  %v511_v53 = vadd.f32 %v509_v51, %v501_v49 }
 0x766   :  { %v535_v54 = vadd.f32 %v533_v52, %v525_v50 }
 0x767   :  { %1064 = vtanh.f32 %v511_v53 }
 0x768   :  { %1066 = vtanh.f32 %v535_v54 }
 0x774   :  { %v1065_v55 = vpop.eup %1064 }
 0x775   :  { %v1067_v56 = vpop.eup %1066  ;;  %514 = vrot.lane.b32.xlu0 %v1065_v55, %s1202_s21 }
 0x776   :  { %538 = vrot.lane.b32.xlu1 %v1067_v56, %s1202_s21 }
 0x7e7   :  { %v515_v57 = vpop.permute.xlu0 %514 }
 0x7e8   :  { %v539_v58 = vpop.permute.xlu1 %538  ;;  %v1360_v59 = vmul.f32 %v1061_v41, %v515_v57 }
 0x7e9   :  { %v541_v60 = vmul.f32 %v1063_v43, %v539_v58  ;;  %v908_v58 = vld [vmem:[%s1416_s6] ss:$0 sm:$0xff]  ;;  %s1164_s6 = scalar_lea.vmem %s857_s29, 512 }
 0x7ea   :  { %561 = vrot.lane.b32.xlu0 %v1360_v59, %s1203_s22  ;;  %v913_v22 = vpack.c.bf16 %v1360_v59, %v1360_v59  ;;  %p1165_p6 = scmp.ne.s32.totalorder %s857_s29, %s1164_s6  ;;  %p1170_p8 = scmp.lt.s32.totalorder %s1164_s6, %s1164_s6 }
 0x7eb   :  { %565 = vrot.lane.b32.xlu1 %v541_v60, %s1204_s23  ;;  %v914_v35 = vpack.c.bf16 %v541_v60, %v541_v60 }
 0x7ec   :  { %p1171_p9 = por %p1170_p8, %p1169_p7 }
 0x7ee   :  { %p1172_p10 = pnand %p1171_p9, %p1165_p6 }
 0x85c   :  { %v562_v61 = vpop.permute.xlu0 %561 }
 0x85d   :  { %v566_v62 = vpop.permute.xlu1 %565 }
 0x85e   :  { %v568_v63 = vsel %vm319_vm2, %v562_v61, %v566_v62 }
 0x85f   :  { %v569_v0 = vpack.c.bf16 %v568_v63, %v568_v63 }
 0x861   :  { %976 = vmatmul.mubr.msk.bf16.vlgmr.msra.gmra.mxu0 %vm120_vm1, %v569_v0 }
 0x862   :  { %986 = vmatpush3.bf16.msra.mxu0 %v1016_v37 }
 0x921   :  { %v607_v1 = vpop.f32.mrf.mxu0 }
 0x922   :  { %v614_v2 = vadd.f32 %v607_v1, %v1311_v18  ;;  %v616_v3 = vadd.f32 %v607_v1, %v1307_v14 }
 0x923   :  { %v977_v4 = vpop.f32.mrf.mxu0 }
 0x924   :  { %1068 = vtanh.f32 %v614_v2  ;;  %v894_v9 = vmul.f32 -1.442695, %v614_v2  ;;  %v895_v10 = vmul.f32 -1.442695, %v616_v3 }
 0x925   :  { %1070 = vtanh.f32 %v616_v3  ;;  %v610_v5 = vpop.f32.mrf.mxu0 }
 0x926   :  { %1072 = vpow2.f32 %v894_v9 }
 0x927   :  { %v978_v6 = vpop.f32.mrf.mxu0  ;;  %1074 = vpow2.f32 %v895_v10 }
 0x931   :  { %v1069_v7 = vpop.eup %1068 }
 0x932   :  { %v1071_v8 = vpop.eup %1070  ;;  %626 = vrot.lane.b32.xlu1 %v1069_v7, %s1201_s2 }
 0x933   :  { %650 = vrot.lane.b32.xlu0 %v1071_v8, %s1201_s2  ;;  %v1073_v12 = vpop.eup %1072 }
 0x934   :  { %v1075_v13 = vpop.eup %1074  ;;  %v620_v18 = vadd.f32 1.0, %v1073_v12 }
 0x935   :  { %v644_v15 = vadd.f32 1.0, %v1075_v13 }
 0x936   :  { %1076 = vrcp.f32 %v620_v18 }
 0x937   :  { %1078 = vrcp.f32 %v644_v15 }
 0x943   :  { %v1077_v14 = vpop.eup %1076 }
 0x944   :  { %v1079_v17 = vpop.eup %1078  ;;  %v624_v24 = vmul.f32 %v1077_v14, %v511_v53 }
 0x945   :  { %v648_v25 = vmul.f32 %v1079_v17, %v535_v54 }
 0x9a4   :  { %v627_v16 = vpop.permute.xlu1 %626 }
 0x9a5   :  { %v651_v19 = vpop.permute.xlu0 %650  ;;  %v629_v20 = vmul.f32 %v1077_v14, %v627_v16 }
 0x9a6   :  { %v653_v21 = vmul.f32 %v1079_v17, %v651_v19 }
 0x9a7   :  { %631 = vrot.lane.b32.xlu1 %v629_v20, %s1202_s21 }
 0x9a8   :  { %655 = vrot.lane.b32.xlu0 %v653_v21, %s1202_s21 }
 0xa19   :  { %v632_v26 = vpop.permute.xlu1 %631 }
 0xa1a   :  { %v656_v27 = vpop.permute.xlu0 %655  ;;  %v634_v28 = vadd.f32 %v632_v26, %v624_v24 }
 0xa1b   :  { %v658_v29 = vadd.f32 %v656_v27, %v648_v25 }
 0xa1c   :  { %1080 = vtanh.f32 %v634_v28 }
 0xa1d   :  { %1082 = vtanh.f32 %v658_v29 }
 0xa29   :  { %v1081_v30 = vpop.eup %1080 }
 0xa2a   :  { %v1083_v31 = vpop.eup %1082  ;;  %637 = vrot.lane.b32.xlu1 %v1081_v30, %s1202_s21 }
 0xa2b   :  { %661 = vrot.lane.b32.xlu0 %v1083_v31, %s1202_s21 }
 0xa2e   :  { %423 = vrot.lane.b32.xlu1 %v911_v32, %s1203_s22 }
 0xa2f   :  { %297 = vrot.lane.b32.xlu0 %v909_v33, %s1203_s22 }
 0xa32   :  { %432 = vrot.lane.b32.xlu1 %v912_v34, %s1205_s24 }
 0xa33   :  { %555 = vrot.lane.b32.xlu0 %v914_v35, %s1205_s24 }
 0xa37   :  { %306 = vrot.lane.b32.xlu0 %v910_v36, %s1205_s24 }
 0xa3b   :  { %546 = vrot.lane.b32.xlu0 %v913_v22, %s1203_s22 }
 0xa9c   :  { %v638_v23 = vpop.permute.xlu1 %637 }
 0xa9d   :  { %v662_v38 = vpop.permute.xlu0 %661  ;;  %v640_v40 = vmul.f32 %v1077_v14, %v638_v23 }
 0xa9e   :  { %v664_v39 = vmul.f32 %v1079_v17, %v662_v38 }
 0xa9f   :  { %v915_v42 = vpack.c.bf16 %v640_v40, %v640_v40 }
 0xaa0   :  { %v916_v46 = vpack.c.bf16 %v664_v39, %v664_v39  ;;  %v424_v11 = vpop.permute.xlu1 %423 }
 0xaa1   :  { %427 = vst.msk [vmem:[#allocation3 + $0x4] sm:$0xf] %vm300_vm3, %v424_v11  ;;  %v298_v41 = vpop.permute.xlu0 %297 }
 0xaa2   :  { %301 = vst.msk [vmem:[#allocation3] sm:$0xf] %vm300_vm3, %v298_v41  ;;  %678 = vrot.lane.b32.xlu1 %v916_v46, %s1205_s24 }
 0xaa4   :  { %v433_v43 = vpop.permute.xlu1 %432 }
 0xaa5   :  { %436 = vst.msk [vmem:[#allocation4 + $0x8] sm:$0xf] %vm300_vm3, %v433_v43  ;;  %v556_v45 = vpop.permute.xlu0 %555 }
 0xaa6   :  { %559 = vst.msk [vmem:[#allocation4 + $0x4] sm:$0xf] %vm300_vm3, %v556_v45  ;;  %669 = vrot.lane.b32.xlu1 %v915_v42, %s1203_s22 }
 0xaa9   :  { %v307_v47 = vpop.permute.xlu0 %306  ;;  %v1014_v48 = vld [vmem:[#allocation3] sm:$0xff]  }
 0xaaa   :  { %310 = vst.msk [vmem:[#allocation4 + $0xc] sm:$0xf] %vm300_vm3, %v307_v47  ;;  %987 = vmatprep.mubr.msk.bf16.mxu0 %vm319_vm2, %v1014_v48 }
 0xaad   :  { %v547_v49 = vpop.permute.xlu0 %546 }
 0xaae   :  { %550 = vst.msk [vmem:[#allocation3 + $0x8] sm:$0xf] %vm300_vm3, %v547_v49 }
 0xab1   :  { %v1018_v53 = vld [vmem:[#allocation4 + $0x8] sm:$0xff]  }
 0xb14   :  { %v679_v50 = vpop.permute.xlu1 %678 }
 0xb15   :  { %681 = vst.msk [vmem:[#allocation4] sm:$0xf] %vm300_vm3, %v679_v50 }
 0xb18   :  { %v670_v51 = vpop.permute.xlu1 %669 }
 0xb19   :  { %673 = vst.msk [vmem:[#allocation3 + $0xc] sm:$0xf] %vm300_vm3, %v670_v51 }
 0xb1c   :  { %v1017_v52 = vld [vmem:[#allocation4] sm:$0xff]  }
 0xb1d   :  { %981 = vmatprep.mubr.msk.bf16.mxu1 %vm319_vm2, %v1017_v52 }
 0xb1e   :  { %982 = vmatmul.mubr.msk.bf16.vlgmr.msra.gmra.mxu1 %vm319_vm2, %v1018_v53 }
 0xb20   :  { %v1019_v54 = vld [vmem:[#allocation3 + $0x8] sm:$0xff]  }
 0xb21   :  { %988 = vmatmul.mubr.msk.bf16.vlgmr.msra.gmra.mxu0 %vm319_vm2, %v1019_v54 }
 0xbde   :  { %v983_v55 = vpop.f32.mrf.mxu1 }
 0xbe0   :  { %v750_v56 = vpop.f32.mrf.mxu1 }
 0xbe1   :  { %v989_v57 = vpop.f32.mrf.mxu0 }
 0xbe2   :  { %v830_v59 = vadd.f32 %v989_v57, %v983_v55  ;;  %v984_v60 = vpop.f32.mrf.mxu1 }
 0xbe3   :  { %v821_v61 = vpop.f32.mrf.mxu0 }
 0xbe4   :  { %v845_v62 = vadd.f32 %v908_v58, %v830_v59  ;;  %v822_v63 = vadd.f32 %v821_v61, %v750_v56  ;;  %v753_v3 = vpop.f32.mrf.mxu1 }
 0xbe5   :  { %v990_v0 = vpop.f32.mrf.mxu0 }
 0xbe6   :  { %849 = vst [vmem:[#allocation13 + $0x10] sm:$0xff] %v845_v62  ;;  %v843_v1 = vadd.f32 %v908_v58, %v822_v63  ;;  %v833_v2 = vadd.f32 %v990_v0, %v984_v60 }
 0xbe7   :  { %v824_v4 = vpop.f32.mrf.mxu0 }
 0xbe8   :  { %847 = vst [vmem:[#allocation13] sm:$0xff] %v843_v1  ;;  %v846_v5 = vadd.f32 %v908_v58, %v833_v2  ;;  %v825_v6 = vadd.f32 %v824_v4, %v753_v3 }
 0xbea   :  { %850 = vst [vmem:[#allocation13 + $0x18] sm:$0xff] %v846_v5  ;;  %v844_v7 = vadd.f32 %v908_v58, %v825_v6 }
 0xbec   :  { %848 = vst [vmem:[#allocation13 + $0x8] sm:$0xff] %v844_v7 }
 0xbed   :  { %1175 = shalt.err (!%p1172_p10)
}
 0xbee   :  { %s1207_s30 = smov 128   ;;  %s1208_s8 = smov 8  }
 0xbef   :  { %862 = dma.vmem_to_hbm [thread:$0]  %s857_s29, 512, %s1417_s7, [#allocation7], %s1207_s30, %s1207_s30, %s1208_s8  }
 0xbf0   :  { %1190 = dma.done.wait [#allocation7], 512  }
 0xbf1   :  { %1191 = vsyncadd [#allocation7], 4294966784 }
 0xbf2   :  { %866 = vsyncpa [#allocation6], 1 }
 0xbf3   :  { %867 = vsyncpa [#allocation9], 1 }
 0xbf4   :  { %868 = vsyncpa [#allocation12], 1 }
 0xbf5   :  { %869 = vsyncpa [#allocation7], 1 }

</bundles_post_ra>
